<compile_context>
chip_gen: v7x
topology: tpu7x:2x2x1
jax: 0.10.0
libtpu: 0.0.40
codegen_flags: <defaults>
</compile_context>

<pallas_src>
import jax
import jax.numpy as jnp
from jax import lax
from jax.experimental import pallas as pl
from jax.experimental.pallas import tpu as pltpu


def _round_up(x: int, m: int) -> int:
    return (x + m - 1) // m * m


def _pick_batch_tile(B: int) -> int:
    """Batch tile: multiple of 8, >=2 grid steps when possible, 256 max on v6e/v7x."""
    try:
        kind = jax.devices()[0].device_kind.lower()
    except Exception:  # pragma: no cover - defensive only
        kind = ""
    max_tb = 256 if ("v6" in kind or "v7" in kind) else 128  # v5e MXU is 128-wide
    if B <= 8:
        return 8
    # Split into >= 2 tiles so the "parallel" axis can feed both v7x TensorCores.
    return min(max_tb, _round_up((B + 1) // 2, 8))


def net_kernel(idx_ref, table_ref, bias_ref, out_ref):
    # idx_ref:   [TB, L]         int32  (one bag of indices per row)
    # table_ref: [V_pad, O_pad]  bf16   (emb @ W^T / L, zero rows/cols for padding)
    # bias_ref:  [1, O_pad]      f32    (padded classes are -1e30)
    # out_ref:   [TB, O_pad]     f32
    idx = idx_ref[...]
    TB, L = idx.shape
    V_pad = table_ref.shape[0]

    # Hoisted once (JAX does not CSE broadcast_in_dim inside loops).
    vocab_iota = lax.broadcasted_iota(jnp.int32, (TB, V_pad), 1)  # [TB, V_pad]

    # L-step accumulation of bag counts (handles duplicate indices exactly).
    # Trace-time unrolled (L static); equivalent to lax.fori_loop(..., unroll=True),
    # but static column slices avoid any in-kernel dynamic_slice.
    counts = jnp.zeros((TB, V_pad), jnp.float32)
    for l in range(L):
        col = idx[:, l:l + 1]                                     # [TB, 1] int32
        counts = counts + (col == vocab_iota).astype(jnp.float32)

    # counts are small exact integers (0..L) -> exact in bf16; MXU runs bf16 at
    # full rate while accumulating in f32.
    logits = jnp.dot(counts.astype(jnp.bfloat16), table_ref[...],
                     preferred_element_type=jnp.float32) + bias_ref[...]

    # Softmax over the class axis (padded classes have -1e30 bias -> exp == 0).
    m = jnp.max(logits, axis=1, keepdims=True)
    e = jnp.exp(logits - m)
    denom = jnp.sum(e, axis=1, keepdims=True)
    # approx reciprocal (EUP slot): rows sum to 1 only to ~1e-3 relative error.
    out_ref[...] = e * pl.reciprocal(denom, approx=True)


def precompute_fused_params(emb, w, b, bag_len):
    """Fold Linear (and the EmbeddingBag 'mean' 1/L) into the embedding table.

    Call once per weight update, NOT per forward. Returns (table_p bf16, bias_p f32),
    padded lane-dense: table_p [V_pad, O_pad], bias_p [1, O_pad].
    """
    V, H = emb.shape
    O = w.shape[0]
    V_pad = _round_up(max(V, 128), 128)   # lane-dense counts / MXU K dim
    O_pad = _round_up(max(O, 128), 128)   # lane-dense class axis

    table = (emb.astype(jnp.float32) @ w.astype(jnp.float32).T) * (1.0 / bag_len)
    table_p = jnp.zeros((V_pad, O_pad), jnp.float32).at[:V, :O].set(table)
    table_p = table_p.astype(jnp.bfloat16)          # halves resident VMEM + DMA bytes
    bias_p = jnp.full((1, O_pad), -1e30, jnp.float32).at[0, :O].set(
        b.astype(jnp.float32))
    return table_p, bias_p


def net_forward(idx, table_p, bias_p, num_classes):
    """idx: [B, L] int indices, table_p/bias_p from precompute_fused_params.
    Returns softmax(fc(embedding_bag_mean(idx))) of shape [B, num_classes]."""
    B, L = idx.shape
    V_pad, O_pad = table_p.shape

    TB = _pick_batch_tile(B)
    B_pad = _round_up(B, TB)
    idx_p = jnp.zeros((B_pad, L), jnp.int32).at[:B].set(idx.astype(jnp.int32))

    # Explicit scoped-VMEM budget: double-buffered tiles + resident table + headroom
    # for in-kernel f32 intermediates (counts / logits / exp). Clamped to [16, 64] MiB.
    idx_tile_bytes = TB * L * 4
    out_tile_bytes = TB * O_pad * 4
    table_bytes = V_pad * O_pad * 2                  # bf16
    bias_bytes = O_pad * 4
    scratch_headroom = 6 * TB * max(V_pad, O_pad) * 4 + (2 << 20)
    vmem_limit = 2 * (idx_tile_bytes + out_tile_bytes + table_bytes + bias_bytes)
    vmem_limit = int(min(max(vmem_limit + scratch_headroom, 16 << 20), 64 << 20))

    out_p = pl.pallas_call(
        net_kernel,
        out_shape=jax.ShapeDtypeStruct((B_pad, O_pad), jnp.float32),
        grid=(B_pad // TB,),
        in_specs=[
            pl.BlockSpec((TB, L), lambda i: (i, 0)),        # idx tile per step
            pl.BlockSpec((V_pad, O_pad), lambda i: (0, 0)),  # fused bf16 table, resident
            pl.BlockSpec((1, O_pad), lambda i: (0, 0)),      # bias, resident
        ],
        out_specs=pl.BlockSpec((TB, O_pad), lambda i: (i, 0)),
        compiler_params=pltpu.CompilerParams(
            dimension_semantics=("parallel",),
            vmem_limit_bytes=vmem_limit),
    )(idx_p, table_p, bias_p)

    return out_p[:B, :num_classes]


if __name__ == "__main__":
    # Small shapes consistent with the module:
    input_size = 32    # V (vocab)
    hidden_size = 32   # H
    output_size = 16   # O (classes)
    batch = 2          # B (number of bags)
    seq = 8            # L (indices per bag)

    key = jax.random.PRNGKey(0)
    k_idx, k_emb, k_w, k_b = jax.random.split(key, 4)

    idx = jax.random.randint(k_idx, (batch, seq), 0, input_size, dtype=jnp.int32)
    emb = jax.random.normal(k_emb, (input_size, hidden_size), dtype=jnp.float32) * 0.1
    w = jax.random.normal(k_w, (output_size, hidden_size), dtype=jnp.float32) * 0.1
    b = jax.random.normal(k_b, (output_size,), dtype=jnp.float32) * 0.1

    # Weights are static per step: fuse Linear into the table once (amortized).
    table_p, bias_p = precompute_fused_params(emb, w, b, bag_len=seq)

    out = net_forward(idx, table_p, bias_p, output_size)
    jax.block_until_ready(out)

    # Pure-JAX reference (matches PyTorch: EmbeddingBag(mean) -> Linear -> Softmax)
    ref_bag = jnp.mean(emb[idx], axis=1)                    # [B, H]
    ref = jax.nn.softmax(ref_bag @ w.T + b[None, :], axis=1)

    assert out.shape == (batch, output_size)
    # bf16 fused table + approx reciprocal in the softmax -> slightly loose tolerance
    assert jnp.allclose(out, ref, atol=5e-3), "mismatch vs reference"

    print("KERNEL_OK")
</pallas_src>

<mosaic_0001>
module attributes {stable_mosaic.version = 11 : i64} {
  func.func @net_kernel(%arg0: i32, %arg1: memref<8x8xi32, #tpu.memory_space<vmem>>, %arg2: memref<128x128xbf16, #tpu.memory_space<vmem>>, %arg3: memref<1x128xf32, #tpu.memory_space<vmem>>, %arg4: memref<8x128xf32, #tpu.memory_space<vmem>>) attributes {dimension_semantics = [#tpu.dimension_semantics<parallel>], iteration_bounds = array<i64: 1>, scalar_prefetch = 0 : i64, scratch_operands = 0 : i64, tpu.core_type = #tpu.core_type<tc>, window_params = [{transform_indices = @transform_0, window_bounds = array<i64: 8, 8>}, {pipeline_mode = #tpu.pipeline_mode<synchronous>, transform_indices = @transform_1, window_bounds = array<i64: 128, 128>}, {pipeline_mode = #tpu.pipeline_mode<synchronous>, transform_indices = @transform_2, window_bounds = array<i64: 1, 128>}, {transform_indices = @transform_3, window_bounds = array<i64: 8, 128>}]} {
    %c0 = arith.constant 0 : index
    %c0_0 = arith.constant 0 : index
    %0 = vector.load %arg1[%c0, %c0_0] : memref<8x8xi32, #tpu.memory_space<vmem>>, vector<8x8xi32>
    %1 = tpu.iota {dimensions = array<i32: 1>} : vector<8x128xi32>
    %cst = arith.constant 0.000000e+00 : f32
    %2 = vector.broadcast %cst : f32 to vector<8x128xf32>
    %3 = vector.extract_strided_slice %0 {offsets = [0, 0], sizes = [8, 1], strides = [1, 1]} : vector<8x8xi32> to vector<8x1xi32>
    %4 = vector.broadcast %3 : vector<8x1xi32> to vector<8x128xi32>
    %5 = arith.cmpi eq, %4, %1 : vector<8x128xi32>
    %6 = arith.extui %5 : vector<8x128xi1> to vector<8x128xi32>
    %7 = arith.sitofp %6 : vector<8x128xi32> to vector<8x128xf32>
    %8 = arith.addf %2, %7 : vector<8x128xf32>
    %9 = vector.extract_strided_slice %0 {offsets = [0, 1], sizes = [8, 1], strides = [1, 1]} : vector<8x8xi32> to vector<8x1xi32>
    %10 = vector.broadcast %9 : vector<8x1xi32> to vector<8x128xi32>
    %11 = arith.cmpi eq, %10, %1 : vector<8x128xi32>
    %12 = arith.extui %11 : vector<8x128xi1> to vector<8x128xi32>
    %13 = arith.sitofp %12 : vector<8x128xi32> to vector<8x128xf32>
    %14 = arith.addf %8, %13 : vector<8x128xf32>
    %15 = vector.extract_strided_slice %0 {offsets = [0, 2], sizes = [8, 1], strides = [1, 1]} : vector<8x8xi32> to vector<8x1xi32>
    %16 = vector.broadcast %15 : vector<8x1xi32> to vector<8x128xi32>
    %17 = arith.cmpi eq, %16, %1 : vector<8x128xi32>
    %18 = arith.extui %17 : vector<8x128xi1> to vector<8x128xi32>
    %19 = arith.sitofp %18 : vector<8x128xi32> to vector<8x128xf32>
    %20 = arith.addf %14, %19 : vector<8x128xf32>
    %21 = vector.extract_strided_slice %0 {offsets = [0, 3], sizes = [8, 1], strides = [1, 1]} : vector<8x8xi32> to vector<8x1xi32>
    %22 = vector.broadcast %21 : vector<8x1xi32> to vector<8x128xi32>
    %23 = arith.cmpi eq, %22, %1 : vector<8x128xi32>
    %24 = arith.extui %23 : vector<8x128xi1> to vector<8x128xi32>
    %25 = arith.sitofp %24 : vector<8x128xi32> to vector<8x128xf32>
    %26 = arith.addf %20, %25 : vector<8x128xf32>
    %27 = vector.extract_strided_slice %0 {offsets = [0, 4], sizes = [8, 1], strides = [1, 1]} : vector<8x8xi32> to vector<8x1xi32>
    %28 = vector.broadcast %27 : vector<8x1xi32> to vector<8x128xi32>
    %29 = arith.cmpi eq, %28, %1 : vector<8x128xi32>
    %30 = arith.extui %29 : vector<8x128xi1> to vector<8x128xi32>
    %31 = arith.sitofp %30 : vector<8x128xi32> to vector<8x128xf32>
    %32 = arith.addf %26, %31 : vector<8x128xf32>
    %33 = vector.extract_strided_slice %0 {offsets = [0, 5], sizes = [8, 1], strides = [1, 1]} : vector<8x8xi32> to vector<8x1xi32>
    %34 = vector.broadcast %33 : vector<8x1xi32> to vector<8x128xi32>
    %35 = arith.cmpi eq, %34, %1 : vector<8x128xi32>
    %36 = arith.extui %35 : vector<8x128xi1> to vector<8x128xi32>
    %37 = arith.sitofp %36 : vector<8x128xi32> to vector<8x128xf32>
    %38 = arith.addf %32, %37 : vector<8x128xf32>
    %39 = vector.extract_strided_slice %0 {offsets = [0, 6], sizes = [8, 1], strides = [1, 1]} : vector<8x8xi32> to vector<8x1xi32>
    %40 = vector.broadcast %39 : vector<8x1xi32> to vector<8x128xi32>
    %41 = arith.cmpi eq, %40, %1 : vector<8x128xi32>
    %42 = arith.extui %41 : vector<8x128xi1> to vector<8x128xi32>
    %43 = arith.sitofp %42 : vector<8x128xi32> to vector<8x128xf32>
    %44 = arith.addf %38, %43 : vector<8x128xf32>
    %45 = vector.extract_strided_slice %0 {offsets = [0, 7], sizes = [8, 1], strides = [1, 1]} : vector<8x8xi32> to vector<8x1xi32>
    %46 = vector.broadcast %45 : vector<8x1xi32> to vector<8x128xi32>
    %47 = arith.cmpi eq, %46, %1 : vector<8x128xi32>
    %48 = arith.extui %47 : vector<8x128xi1> to vector<8x128xi32>
    %49 = arith.sitofp %48 : vector<8x128xi32> to vector<8x128xf32>
    %50 = arith.addf %44, %49 : vector<8x128xf32>
    %51 = arith.truncf %50 : vector<8x128xf32> to vector<8x128xbf16>
    %c0_1 = arith.constant 0 : index
    %c0_2 = arith.constant 0 : index
    %52 = vector.load %arg2[%c0_1, %c0_2] : memref<128x128xbf16, #tpu.memory_space<vmem>>, vector<128x128xbf16>
    %cst_3 = arith.constant dense<0.000000e+00> : vector<8x128xf32>
    %53 = tpu.matmul %51, %52, %cst_3 {dimension_numbers = #tpu.dot_dimension_numbers<[1], [0], [0], [1], [0, 0, 1, 1], [], []>} : vector<8x128xbf16>, vector<128x128xbf16>, vector<8x128xf32> -> vector<8x128xf32>
    %c0_4 = arith.constant 0 : index
    %c0_5 = arith.constant 0 : index
    %54 = vector.load %arg3[%c0_4, %c0_5] : memref<1x128xf32, #tpu.memory_space<vmem>>, vector<1x128xf32>
    %55 = vector.broadcast %54 : vector<1x128xf32> to vector<8x128xf32>
    %56 = arith.addf %53, %55 : vector<8x128xf32>
    %cst_6 = arith.constant dense<0xFF800000> : vector<8xf32>
    %57 = vector.multi_reduction <maximumf>, %56, %cst_6 [1] : vector<8x128xf32> to vector<8xf32>
    %58 = vector.shape_cast %57 : vector<8xf32> to vector<8x1xf32>
    %59 = vector.broadcast %58 : vector<8x1xf32> to vector<8x128xf32>
    %60 = arith.subf %56, %59 : vector<8x128xf32>
    %61 = math.exp %60 : vector<8x128xf32>
    %cst_7 = arith.constant dense<0.000000e+00> : vector<8xf32>
    %62 = vector.multi_reduction <add>, %61, %cst_7 [1] : vector<8x128xf32> to vector<8xf32>
    %63 = vector.shape_cast %62 : vector<8xf32> to vector<8x1xf32>
    %64 = tpu.reciprocal %63 {approx = true} : vector<8x1xf32> -> vector<8x1xf32>
    %65 = vector.broadcast %64 : vector<8x1xf32> to vector<8x128xf32>
    %66 = arith.mulf %61, %65 : vector<8x128xf32>
    %c0_8 = arith.constant 0 : index
    %c0_9 = arith.constant 0 : index
    %67 = vector.load %arg4[%c0_8, %c0_9] : memref<8x128xf32, #tpu.memory_space<vmem>>, vector<8x128xf32>
    tpu.vector_store %arg4[%c0_8, %c0_9], %66 {strides = array<i32>} : memref<8x128xf32, #tpu.memory_space<vmem>>, vector<8x128xf32>,
    return
  }
  func.func @transform_0(%arg0: i32) -> (i32, i32) {
    %c0_i32 = arith.constant 0 : i32
    %c0_i32_0 = arith.constant 0 : i32
    return %arg0, %c0_i32 : i32, i32
  }
  func.func @transform_1(%arg0: i32) -> (i32, i32) {
    %c0_i32 = arith.constant 0 : i32
    %c0_i32_0 = arith.constant 0 : i32
    %c0_i32_1 = arith.constant 0 : i32
    return %c0_i32, %c0_i32_0 : i32, i32
  }
  func.func @transform_2(%arg0: i32) -> (i32, i32) {
    %c0_i32 = arith.constant 0 : i32
    %c0_i32_0 = arith.constant 0 : i32
    %c0_i32_1 = arith.constant 0 : i32
    return %c0_i32, %c0_i32_0 : i32, i32
  }
  func.func @transform_3(%arg0: i32) -> (i32, i32) {
    %c0_i32 = arith.constant 0 : i32
    %c0_i32_0 = arith.constant 0 : i32
    return %arg0, %c0_i32 : i32, i32
  }
}

</mosaic_0001>

<bundles_post_ra>
// kernel: tpu_custom_call.1
= control target key start
LH: loop header
LB: loop body
LE: loop exit
PB: predicated region body
PF: predicated region fallthrough
CT: control target
= control target key end

     0   :  { %8 = vsyncpa [#allocation3], 0  ;;  %s491_s0 = inlined_call_operand.hbm [shape: s32[8,8], index: 0, kind: input, shape index: {}]   ;;  %s492_s1 = inlined_call_operand.hbm [shape: bf16[128,128], index: 1, kind: input, shape index: {}]   ;;  %s493_s2 = inlined_call_operand.vmem [shape: f32[1,128], index: 2, kind: input, shape index: {}]   ;;  %s494_s3 = inlined_call_operand.hbm [shape: f32[8,128], index: 3, kind: output, shape index: {}]  }
   0x1   :  { %9 = vsyncpa [#allocation6], 0 }
   0x2   :  { %10 = vsyncpa [#allocation4], 0  ;;  %s393_s12 = smov [#allocation2]   ;;  %s394_s14 = smov [#allocation5]  }
   0x3   :  { %s17_s13 = sshll.u32 %s393_s12, 4  ;;  %s26_s15 = sshll.u32 %s394_s14, 4  ;;  %s18_s13 = int_to_ptr.vmem [resolvable:$true] %s17_s13  ;;  %s428_s15 = int_to_ptr.vmem [resolvable:$true] %s26_s15 }
   0x4   :  { %s321_s18 = scalar_lea.hbm %s491_s0, 128 }
   0x5   :  { %p322_p0 = scmp.ne.s32.totalorder %s491_s0, %s321_s18  ;;  %p325_p1 = scmp.lt.u32.totalorder %s321_s18, %s491_s0 }
   0x7   :  { %p327_p2 = pnand %p325_p1, %p322_p0 }
   0x9   :  { %330 = shalt.err (!%p327_p2)
}
   0xa   :  { %s331_s23 = scalar_lea.vmem %s18_s13, 128  ;;  %p336_p4 = scmp.lt.s32.totalorder %s18_s13, %s18_s13 }
   0xb   :  { %p332_p3 = scmp.ne.s32.totalorder %s18_s13, %s331_s23  ;;  %p337_p5 = scmp.lt.s32.totalorder %s331_s23, %s331_s23 }
   0xd   :  { %p338_p6 = por %p337_p5, %p336_p4 }
   0xf   :  { %p339_p7 = pnand %p338_p6, %p332_p3 }
  0x11   :  { %342 = shalt.err (!%p339_p7)
}
  0x12   :  { %20 = dma.hbm_to_vmem [thread:$0]  %s491_s0, 128, %s18_s13, [#allocation3]  }
  0x13   :  { %s343_s28 = scalar_lea.hbm %s492_s1, 1024 }
  0x14   :  { %p344_p8 = scmp.ne.s32.totalorder %s492_s1, %s343_s28  ;;  %p347_p9 = scmp.lt.u32.totalorder %s343_s28, %s492_s1 }
  0x16   :  { %p349_p10 = pnand %p347_p9, %p344_p8 }
  0x18   :  { %352 = shalt.err (!%p349_p10)
}
  0x19   :  { %s353_s6 = scalar_lea.vmem %s428_s15, 1024  ;;  %p358_p12 = scmp.lt.s32.totalorder %s428_s15, %s428_s15 }
  0x1a   :  { %p354_p11 = scmp.ne.s32.totalorder %s428_s15, %s353_s6  ;;  %p359_p13 = scmp.lt.s32.totalorder %s353_s6, %s353_s6 }
  0x1c   :  { %p360_p0 = por %p359_p13, %p358_p12 }
  0x1e   :  { %p361_p1 = pnand %p360_p0, %p354_p11 }
  0x20   :  { %364 = shalt.err (!%p361_p1)
}
  0x21   :  { %s395_s0 = smov 64   ;;  %s396_s7 = smov 4  }
  0x22   :  { %32 = dma.hbm_to_vmem [thread:$0]  %s492_s1, 1024, %s428_s15, [#allocation6], %s395_s0, %s395_s0, %s396_s7  }
  0x23   :  { %387 = dma.done.wait [#allocation3], 128  }
  0x24   :  { %388 = vsyncadd [#allocation3], 4294967168 }
  0x25   :  { %389 = dma.done.wait [#allocation6], 1024  }
  0x26   :  { %390 = vsyncadd [#allocation6], 4294966272  ;;  %v397_v0 = vmov 2   ;;  %v398_v1 = vmov 0   ;;  %v399_v2 = vmov 0.0   ;;  %v42_v3 = vld [vmem:[#allocation2] sm:$0xff]  ;;  %v43_v18 = vlaneseq }
  0x27   :  { %302 = vset.pattern.permute.xlu1 %v397_v0  ;;  %300 = vset.pattern.permute.xlu0 %v398_v1  ;;  %v309_v4 = vld [vmem:[#allocation5] sm:$0xff]   ;;  %v310_v5 = vld [vmem:[#allocation5 + $0x8] sm:$0xff]   ;;  %v400_v6 = vmov 3   ;;  %v401_v7 = vmov 1   ;;  %v311_v8 = vld [vmem:[#allocation5 + $0x10] sm:$0xff]   ;;  %v402_v9 = vmov 4  }
  0x28   :  { %265 = vmatprep.subr.bf16.mxu0 %v399_v2  ;;  %60 = vperm.xlu1 %302, %v42_v3   ;;  %v403_v10 = vmov 5   ;;  %v312_v11 = vld [vmem:[#allocation5 + $0x18] sm:$0xff]   ;;  %v404_v12 = vmov 6   ;;  %v405_v13 = vmov 7   ;;  %v313_v14 = vld [vmem:[#allocation5 + $0x20] sm:$0xff]   ;;  %v314_v15 = vld [vmem:[#allocation5 + $0x28] sm:$0xff]  }
  0x29   :  { %46 = vperm.xlu0 %300, %v42_v3   ;;  %266 = vmatpush3.bf16.msra.mxu0 %v309_v4  ;;  %v315_v16 = vld [vmem:[#allocation5 + $0x30] sm:$0xff]   ;;  %vm406_vm0 = vmmov 0   ;;  %v316_v17 = vld [vmem:[#allocation5 + $0x38] sm:$0xff]   ;;  %v44_v21 = vand.u32 127, %v43_v18  ;;  %s407_s11 = smov [#allocation7]  }
  0x2a   :  { %267 = vmatprep.subr.bf16.mxu0 %v399_v2  ;;  %281 = vmatprep.mubr.msk.bf16.mxu0 %vm406_vm0, %v399_v2  ;;  %v247_v44 = vld [vmem:[%s493_s2] ss:$0 sm:$0xff]  ;;  %s229_s12 = sshll.u32 %s407_s11, 4  ;;  %s230_s12 = int_to_ptr.vmem [resolvable:$true] %s229_s12 }
  0x2b   :  { %s365_s2 = scalar_lea.vmem %s230_s12, 128  ;;  %p370_p3 = scmp.lt.s32.totalorder %s230_s12, %s230_s12 }
  0x2c   :  { %303 = vset.pattern.permute.xlu1 %v400_v6  ;;  %p366_p2 = scmp.ne.s32.totalorder %s230_s12, %s365_s2  ;;  %p371_p4 = scmp.lt.s32.totalorder %s365_s2, %s365_s2 }
  0x2d   :  { %301 = vset.pattern.permute.xlu0 %v401_v7  ;;  %67 = vperm.xlu1 %303, %v42_v3  }
  0x2e   :  { %53 = vperm.xlu0 %301, %v42_v3   ;;  %268 = vmatpush3.bf16.msra.mxu0 %v310_v5  ;;  %p372_p5 = por %p371_p4, %p370_p3 }
  0x2f   :  { %269 = vmatprep.subr.bf16.mxu0 %v399_v2 }
  0x30   :  { %p373_p6 = pnand %p372_p5, %p366_p2 }
  0x31   :  { %304 = vset.pattern.permute.xlu1 %v402_v9 }
  0x32   :  { %305 = vset.pattern.permute.xlu0 %v403_v10  ;;  %74 = vperm.xlu1 %304, %v42_v3  }
  0x33   :  { %81 = vperm.xlu0 %305, %v42_v3   ;;  %270 = vmatpush3.bf16.msra.mxu0 %v311_v8 }
  0x34   :  { %271 = vmatprep.subr.bf16.mxu0 %v399_v2 }
  0x36   :  { %306 = vset.pattern.permute.xlu1 %v404_v12 }
  0x37   :  { %308 = vset.pattern.permute.xlu0 %v405_v13  ;;  %88 = vperm.xlu1 %306, %v42_v3  }
  0x38   :  { %272 = vmatpush3.bf16.msra.mxu0 %v312_v11 }
  0x39   :  { %273 = vmatprep.subr.bf16.mxu0 %v399_v2 }
  0x3b   :  { %307 = vset.pattern.permute.xlu1 %v405_v13 }
  0x3c   :  { %274 = vmatpush3.bf16.msra.mxu0 %v313_v14  ;;  %95 = vperm.xlu1 %307, %v42_v3  }
  0x3d   :  { %275 = vmatprep.subr.bf16.mxu0 %v399_v2 }
  0x40   :  { %276 = vmatpush3.bf16.msra.mxu0 %v314_v15 }
  0x41   :  { %277 = vmatprep.subr.bf16.mxu0 %v399_v2 }
  0x44   :  { %278 = vmatpush3.bf16.msra.mxu0 %v315_v16 }
  0x45   :  { %279 = vmatprep.subr.bf16.mxu0 %v399_v2 }
  0x48   :  { %280 = vmatpush3.bf16.msra.mxu0 %v316_v17 }
  0xa7   :  { %v61_v19 = vpop.permute.xlu1 %60 }
  0xa8   :  { %v47_v20 = vpop.permute.xlu0 %46  ;;  %vm62_vm2 = vcmp.eq.s32.totalorder %v61_v19, %v44_v21 }
  0xa9   :  { %vm48_vm1 = vcmp.eq.s32.totalorder %v47_v20, %v44_v21  ;;  %v241_v27 = vsel %vm62_vm2, 1.0, %v399_v2 }
  0xaa   :  { %v239_v24 = vsel %vm48_vm1, 1.0, %v399_v2 }
  0xac   :  { %v68_v22 = vpop.permute.xlu1 %67 }
  0xad   :  { %v54_v23 = vpop.permute.xlu0 %53  ;;  %vm69_vm4 = vcmp.eq.s32.totalorder %v68_v22, %v44_v21 }
  0xae   :  { %vm55_vm3 = vcmp.eq.s32.totalorder %v54_v23, %v44_v21  ;;  %v242_v31 = vsel %vm69_vm4, 1.0, %v399_v2 }
  0xaf   :  { %v240_v25 = vsel %vm55_vm3, 1.0, %v399_v2 }
  0xb0   :  { %v58_v26 = vadd.f32 %v240_v25, %v239_v24 }
  0xb1   :  { %v75_v29 = vpop.permute.xlu1 %74 }
  0xb2   :  { %v65_v28 = vadd.f32 %v241_v27, %v58_v26  ;;  %v82_v30 = vpop.permute.xlu0 %81  ;;  %vm76_vm5 = vcmp.eq.s32.totalorder %v75_v29, %v44_v21 }
  0xb3   :  { %vm83_vm6 = vcmp.eq.s32.totalorder %v82_v30, %v44_v21  ;;  %v243_v33 = vsel %vm76_vm5, 1.0, %v399_v2 }
  0xb4   :  { %v72_v32 = vadd.f32 %v242_v31, %v65_v28  ;;  %v244_v35 = vsel %vm83_vm6, 1.0, %v399_v2 }
  0xb6   :  { %v79_v34 = vadd.f32 %v243_v33, %v72_v32  ;;  %v89_v36 = vpop.permute.xlu1 %88 }
  0xb7   :  { %vm90_vm7 = vcmp.eq.s32.totalorder %v89_v36, %v44_v21 }
  0xb8   :  { %v86_v37 = vadd.f32 %v244_v35, %v79_v34  ;;  %v245_v38 = vsel %vm90_vm7, 1.0, %v399_v2 }
  0xba   :  { %v93_v40 = vadd.f32 %v245_v38, %v86_v37 }
  0xbb   :  { %v96_v39 = vpop.permute.xlu1 %95 }
  0xbc   :  { %vm97_vm8 = vcmp.eq.s32.totalorder %v96_v39, %v44_v21 }
  0xbd   :  { %v246_v41 = vsel %vm97_vm8, 1.0, %v399_v2 }
  0xbe   :  { %v100_v42 = vadd.f32 %v246_v41, %v93_v40 }
  0xc0   :  { %v101_v43 = vpack.c.bf16 %v100_v42, %v100_v42 }
  0xc2   :  { %282 = vmatmul.mubr.bf16.vlgmr.msra.gmra.mrb[0].mxu0 %v101_v43 }
 0x195   :  { %v207_v45 = vpop.f32.mrb[0].mxu0 }
 0x196   :  { %v208_v46 = vadd.f32 %v247_v44, %v207_v45  ;;  %v283_v47 = vpop.f32.mrb[1].mxu0 }
 0x197   :  { %v210_v48 = vpop.f32.mrb[2].mxu0 }
 0x198   :  { %213 = vmax.xlane.f32.xlu0 %v208_v46  ;;  %v284_v49 = vpop.f32.mrb[3].mxu0 }
 0x225   :  { %v214_v50 = vpop.xlane.xlu0 %213 }
 0x226   :  { %v215_v51 = vsub.f32 %v208_v46, %v214_v50 }
 0x228   :  { %v216_v52 = vmul.f32 1.442695, %v215_v51 }
 0x22a   :  { %317 = vpow2.f32 %v216_v52 }
 0x234   :  { %v318_v53 = vpop.eup %317 }
 0x235   :  { %218 = vadd.xlane.f32.xlu1 %v318_v53 }
 0x2c2   :  { %v219_v54 = vpop.xlane.xlu1 %218 }
 0x2c3   :  { %319 = vrcp.f32 %v219_v54 }
 0x2cd   :  { %v320_v55 = vpop.eup %319 }
 0x2ce   :  { %v221_v56 = vmul.f32 %v320_v55, %v318_v53 }
 0x2d0   :  { %222 = vst [vmem:[#allocation7] sm:$0xff] %v221_v56 }
 0x2d1   :  { %376 = shalt.err (!%p373_p6)
}
 0x2d2   :  { %s377_s15 = scalar_lea.hbm %s494_s3, 128 }
 0x2d3   :  { %p378_p7 = scmp.ne.s32.totalorder %s494_s3, %s377_s15  ;;  %p381_p8 = scmp.lt.u32.totalorder %s377_s15, %s494_s3 }
 0x2d5   :  { %p383_p9 = pnand %p381_p8, %p378_p7 }
 0x2d7   :  { %386 = shalt.err (!%p383_p9)
}
 0x2d8   :  { %232 = dma.vmem_to_hbm [thread:$0]  %s230_s12, 128, %s494_s3, [#allocation4]  }
 0x2d9   :  { %391 = dma.done.wait [#allocation4], 128  }
 0x2da   :  { %392 = vsyncadd [#allocation4], 4294967168 }
 0x2db   :  { %236 = vsyncpa [#allocation3], 1 }
 0x2dc   :  { %237 = vsyncpa [#allocation6], 1 }
 0x2dd   :  { %238 = vsyncpa [#allocation4], 1 }

</bundles_post_ra>
